<compile_context>
chip_gen: v5e
topology: v5e:2x2
jax: 0.10.0
libtpu: 0.0.40
codegen_flags: <defaults>
</compile_context>

<pallas_src>
import functools

import jax
import jax.numpy as jnp
from jax.experimental import pallas as pl
from jax.experimental.pallas import tpu as pltpu

# Resident-XW budget: double-buffered bf16 copy of (n_p, f_p) must stay under
# this to be held in VMEM for the whole aggregation (conservative for v7x).
_XW_RESIDENT_BYTES = 8 * 1024 * 1024
_VMEM_LIMIT_BYTES = 32 * 1024 * 1024


def _round_up(x, m):
    return ((x + m - 1) // m) * m


def _pick_tiles(n_p):
    """Pick (tm, tk): multiples of 128 that divide n_p, capped at 512.

    tm (parallel row axis) additionally capped at n_p // 2 when possible so the
    grid keeps >= 2 row tiles for 2-TC megacore sharding on v7x.
    """

    def largest_div(cap):
        t = min(cap, n_p)
        t -= t % 128
        t = max(t, 128)
        while n_p % t:
            t -= 128
        return t

    tm = largest_div(min(512, max(128, n_p // 2)))
    tk = largest_div(512)
    return tm, tk


# ---------------------------------------------------------------------------
# Kernel 1: dense feature transform  XW1 = X @ W1   (bf16 MXU, f32 acc)
# ---------------------------------------------------------------------------
def transform_kernel(x_ref, w_ref, o_ref):
    o_ref[...] = jnp.dot(
        x_ref[...], w_ref[...], preferred_element_type=jnp.float32
    ).astype(o_ref.dtype)


def feature_transform(x_bf, w_bf, *, tm):
    n_p, f_in = x_bf.shape
    f_p = w_bf.shape[1]
    return pl.pallas_call(
        transform_kernel,
        out_shape=jax.ShapeDtypeStruct((n_p, f_p), jnp.bfloat16),
        grid_spec=pltpu.PrefetchScalarGridSpec(
            num_scalar_prefetch=0,
            grid=(n_p // tm,),
            in_specs=[
                pl.BlockSpec((tm, f_in), lambda i: (i, 0)),
                pl.BlockSpec((f_in, f_p), lambda i: (0, 0)),
            ],
            out_specs=pl.BlockSpec((tm, f_p), lambda i: (i, 0)),
        ),
        compiler_params=pltpu.CompilerParams(
            dimension_semantics=("parallel",),
            vmem_limit_bytes=_VMEM_LIMIT_BYTES,
        ),
        cost_estimate=pl.CostEstimate(
            flops=2 * n_p * f_in * f_p,
            transcendentals=0,
            bytes_accessed=n_p * f_in * 2 + f_in * f_p * 2 + n_p * f_p * 2,
        ),
    )(x_bf, w_bf)


# ---------------------------------------------------------------------------
# Kernel 2 (fused, layer 1): XW2 = relu(A @ XW1 + b1) @ W2   (bf16 output)
#   grid = (row tiles [parallel], K tiles over A's columns [arbitrary, last])
#   f32 VMEM accumulator for A@XW1; finalize does bias + ReLU + W2 matmul.
# ---------------------------------------------------------------------------
def fused_aggregate_kernel(a_ref, xw_ref, b1_ref, w2_ref, o_ref, acc_ref, *,
                           tk, xw_resident):
    k = pl.program_id(1)

    @pl.when(k == 0)
    def _():
        acc_ref[...] = jnp.zeros_like(acc_ref)

    if xw_resident:
        xw_blk = xw_ref[pl.ds(pl.multiple_of(k * tk, 128), tk), :]
    else:
        xw_blk = xw_ref[...]
    acc_ref[...] += jnp.dot(a_ref[...], xw_blk,
                            preferred_element_type=jnp.float32)

    @pl.when(k == pl.num_programs(1) - 1)
    def _():
        h1 = jnp.maximum(acc_ref[...] + b1_ref[...], 0.0)  # f32 epilogue
        o_ref[...] = jnp.dot(
            h1.astype(jnp.bfloat16), w2_ref[...],
            preferred_element_type=jnp.float32,
        ).astype(o_ref.dtype)


def fused_aggregate(a_bf, xw1_bf, b1, w2_bf, *, tm, tk):
    n_p = a_bf.shape[0]
    hid_p = xw1_bf.shape[1]
    out_p = w2_bf.shape[1]

    xw_resident = 2 * n_p * hid_p * 2 <= _XW_RESIDENT_BYTES
    if xw_resident:
        xw_spec = pl.BlockSpec((n_p, hid_p), lambda i, k: (0, 0))
    else:
        xw_spec = pl.BlockSpec((tk, hid_p), lambda i, k: (k, 0))

    kernel = functools.partial(fused_aggregate_kernel, tk=tk,
                               xw_resident=xw_resident)
    return pl.pallas_call(
        kernel,
        out_shape=jax.ShapeDtypeStruct((n_p, out_p), jnp.bfloat16),
        grid_spec=pltpu.PrefetchScalarGridSpec(
            num_scalar_prefetch=0,
            grid=(n_p // tm, n_p // tk),
            in_specs=[
                pl.BlockSpec((tm, tk), lambda i, k: (i, k)),
                xw_spec,
                pl.BlockSpec((1, hid_p), lambda i, k: (0, 0)),
                pl.BlockSpec((hid_p, out_p), lambda i, k: (0, 0)),
            ],
            out_specs=pl.BlockSpec((tm, out_p), lambda i, k: (i, 0)),
            scratch_shapes=[pltpu.VMEM((tm, hid_p), jnp.float32)],
        ),
        compiler_params=pltpu.CompilerParams(
            dimension_semantics=("parallel", "arbitrary"),
            vmem_limit_bytes=_VMEM_LIMIT_BYTES,
        ),
        cost_estimate=pl.CostEstimate(
            flops=2 * n_p * n_p * hid_p + 2 * n_p * hid_p * out_p,
            transcendentals=0,
            bytes_accessed=(n_p * n_p * 2 + n_p * hid_p * 2
                            + hid_p * out_p * 2 + n_p * out_p * 2
                            + hid_p * 4),
        ),
    )(a_bf, xw1_bf, b1, w2_bf)


# ---------------------------------------------------------------------------
# Kernel 3 (layer 2): H2 = A @ XW2 + b2   (f32 output, no scratch: accumulate
# directly into the K-resident output block)
# ---------------------------------------------------------------------------
def aggregate_kernel(a_ref, xw_ref, b_ref, o_ref, *, tk, xw_resident):
    k = pl.program_id(1)

    @pl.when(k == 0)
    def _():
        o_ref[...] = jnp.zeros_like(o_ref)

    if xw_resident:
        xw_blk = xw_ref[pl.ds(pl.multiple_of(k * tk, 128), tk), :]
    else:
        xw_blk = xw_ref[...]
    o_ref[...] += jnp.dot(a_ref[...], xw_blk,
                          preferred_element_type=jnp.float32)

    @pl.when(k == pl.num_programs(1) - 1)
    def _():
        o_ref[...] += b_ref[...]


def aggregate(a_bf, xw_bf, bias, *, tm, tk):
    n_p = a_bf.shape[0]
    f_p = xw_bf.shape[1]

    xw_resident = 2 * n_p * f_p * 2 <= _XW_RESIDENT_BYTES
    if xw_resident:
        xw_spec = pl.BlockSpec((n_p, f_p), lambda i, k: (0, 0))
    else:
        xw_spec = pl.BlockSpec((tk, f_p), lambda i, k: (k, 0))

    kernel = functools.partial(aggregate_kernel, tk=tk,
                               xw_resident=xw_resident)
    return pl.pallas_call(
        kernel,
        out_shape=jax.ShapeDtypeStruct((n_p, f_p), jnp.float32),
        grid_spec=pltpu.PrefetchScalarGridSpec(
            num_scalar_prefetch=0,
            grid=(n_p // tm, n_p // tk),
            in_specs=[
                pl.BlockSpec((tm, tk), lambda i, k: (i, k)),
                xw_spec,
                pl.BlockSpec((1, f_p), lambda i, k: (0, 0)),
            ],
            out_specs=pl.BlockSpec((tm, f_p), lambda i, k: (i, 0)),
        ),
        compiler_params=pltpu.CompilerParams(
            dimension_semantics=("parallel", "arbitrary"),
            vmem_limit_bytes=_VMEM_LIMIT_BYTES,
        ),
        cost_estimate=pl.CostEstimate(
            flops=2 * n_p * n_p * f_p,
            transcendentals=0,
            bytes_accessed=(n_p * n_p * 2 + n_p * f_p * 2
                            + n_p * f_p * 4 + f_p * 4),
        ),
    )(a_bf, xw_bf, bias)


# ---------------------------------------------------------------------------
# Full 2-layer GCN forward
# ---------------------------------------------------------------------------
def gcn_forward(a_norm, x, w1, b1, w2, b2):
    n, f_in = x.shape
    hid = w1.shape[1]
    f_out = w2.shape[1]

    n_p = _round_up(n, 128)
    hid_p = _round_up(hid, 128)
    out_p = _round_up(f_out, 128)
    tm, tk = _pick_tiles(n_p)

    # Pad + cast directly to bf16 (no f32 intermediate for the O(N^2) array).
    # Padded A rows/cols are zero so padded nodes never pollute real outputs.
    a_bf = jnp.zeros((n_p, n_p), jnp.bfloat16).at[:n, :n].set(
        a_norm.astype(jnp.bfloat16))
    x_bf = jnp.zeros((n_p, f_in), jnp.bfloat16).at[:n, :].set(
        x.astype(jnp.bfloat16))
    w1_bf = jnp.zeros((f_in, hid_p), jnp.bfloat16).at[:, :hid].set(
        w1.astype(jnp.bfloat16))
    b1_p = jnp.zeros((1, hid_p), jnp.float32).at[:, :hid].set(b1)
    w2_bf = jnp.zeros((hid_p, out_p), jnp.bfloat16).at[:hid, :f_out].set(
        w2.astype(jnp.bfloat16))
    b2_p = jnp.zeros((1, out_p), jnp.float32).at[:, :f_out].set(b2)

    # Layer 1 transform: XW1 = X @ W1                      (bf16, n_p x hid_p)
    xw1 = feature_transform(x_bf, w1_bf, tm=tm)
    # Layer 1 aggregate fused with layer 2 transform:
    #   XW2 = relu(A @ XW1 + b1) @ W2                      (bf16, n_p x out_p)
    xw2 = fused_aggregate(a_bf, xw1, b1_p, w2_bf, tm=tm, tk=tk)
    # Layer 2 aggregate: H2 = A @ XW2 + b2                 (f32,  n_p x out_p)
    h2 = aggregate(a_bf, xw2, b2_p, tm=tm, tk=tk)

    return h2[:n, :f_out]


def build_normalized_adjacency(key, n):
    """Random undirected graph + self-loops, symmetric D^{-1/2} A D^{-1/2}."""
    upper = jax.random.bernoulli(key, p=0.3, shape=(n, n)).astype(jnp.float32)
    upper = jnp.triu(upper, k=1)
    adj = upper + upper.T + jnp.eye(n, dtype=jnp.float32)
    deg = jnp.sum(adj, axis=1)
    d_inv_sqrt = 1.0 / jnp.sqrt(deg)
    return adj * d_inv_sqrt[:, None] * d_inv_sqrt[None, :]


if __name__ == "__main__":
    # Small shapes consistent with GCN(in_feats, hidden_feats, out_feats);
    # N=256 exercises the tiled row/K aggregation (grid = (2, 1) here).
    N, IN_FEATS, HIDDEN_FEATS, OUT_FEATS = 256, 16, 32, 8

    key = jax.random.PRNGKey(0)
    k_adj, k_x, k_w1, k_b1, k_w2, k_b2 = jax.random.split(key, 6)

    a_norm = build_normalized_adjacency(k_adj, N)
    x = jax.random.normal(k_x, (N, IN_FEATS), dtype=jnp.float32)

    lim1 = (6.0 / (IN_FEATS + HIDDEN_FEATS)) ** 0.5
    lim2 = (6.0 / (HIDDEN_FEATS + OUT_FEATS)) ** 0.5
    w1 = jax.random.uniform(k_w1, (IN_FEATS, HIDDEN_FEATS), jnp.float32, -lim1, lim1)
    b1 = jax.random.uniform(k_b1, (1, HIDDEN_FEATS), jnp.float32, -0.1, 0.1)
    w2 = jax.random.uniform(k_w2, (HIDDEN_FEATS, OUT_FEATS), jnp.float32, -lim2, lim2)
    b2 = jax.random.uniform(k_b2, (1, OUT_FEATS), jnp.float32, -0.1, 0.1)

    gcn = jax.jit(gcn_forward)
    out = gcn(a_norm, x, w1, b1, w2, b2)
    out = jax.block_until_ready(out)
    assert out.shape == (N, OUT_FEATS)

    # Pure-JAX reference mimicking the kernel's numerics (bf16 MXU inputs,
    # f32 accumulation, f32 epilogue, bf16 intermediates).
    a_bf = a_norm.astype(jnp.bfloat16)
    xw1_r = jnp.dot(x.astype(jnp.bfloat16), w1.astype(jnp.bfloat16),
                    preferred_element_type=jnp.float32).astype(jnp.bfloat16)
    h1_r = jnp.maximum(
        jnp.dot(a_bf, xw1_r, preferred_element_type=jnp.float32) + b1, 0.0)
    xw2_r = jnp.dot(h1_r.astype(jnp.bfloat16), w2.astype(jnp.bfloat16),
                    preferred_element_type=jnp.float32).astype(jnp.bfloat16)
    ref = jnp.dot(a_bf, xw2_r, preferred_element_type=jnp.float32) + b2

    max_err = float(jnp.max(jnp.abs(out - ref)))
    assert jnp.allclose(out, ref, atol=2e-2, rtol=2e-2), max_err

    print("KERNEL_OK")
</pallas_src>

<mosaic_0001>
module attributes {stable_mosaic.version = 11 : i64} {
  func.func @transform_kernel(%arg0: i32, %arg1: memref<128x16xbf16, #tpu.memory_space<vmem>>, %arg2: memref<16x128xbf16, #tpu.memory_space<vmem>>, %arg3: memref<128x128xbf16, #tpu.memory_space<vmem>>) attributes {dimension_semantics = [#tpu.dimension_semantics<parallel>], iteration_bounds = array<i64: 2>, scalar_prefetch = 0 : i64, scratch_operands = 0 : i64, tpu.core_type = #tpu.core_type<tc>, window_params = [{transform_indices = @transform_0, window_bounds = array<i64: 128, 16>}, {pipeline_mode = #tpu.pipeline_mode<synchronous>, transform_indices = @transform_1, window_bounds = array<i64: 16, 128>}, {transform_indices = @transform_2, window_bounds = array<i64: 128, 128>}]} {
    %c0 = arith.constant 0 : index
    %c0_0 = arith.constant 0 : index
    %0 = vector.load %arg1[%c0, %c0_0] : memref<128x16xbf16, #tpu.memory_space<vmem>>, vector<128x16xbf16>
    %c0_1 = arith.constant 0 : index
    %c0_2 = arith.constant 0 : index
    %1 = vector.load %arg2[%c0_1, %c0_2] : memref<16x128xbf16, #tpu.memory_space<vmem>>, vector<16x128xbf16>
    %cst = arith.constant dense<0.000000e+00> : vector<128x128xf32>
    %2 = tpu.matmul %0, %1, %cst {dimension_numbers = #tpu.dot_dimension_numbers<[1], [0], [0], [1], [0, 0, 1, 1], [], []>} : vector<128x16xbf16>, vector<16x128xbf16>, vector<128x128xf32> -> vector<128x128xf32>
    %3 = arith.truncf %2 : vector<128x128xf32> to vector<128x128xbf16>
    %c0_3 = arith.constant 0 : index
    %c0_4 = arith.constant 0 : index
    %4 = vector.load %arg3[%c0_3, %c0_4] : memref<128x128xbf16, #tpu.memory_space<vmem>>, vector<128x128xbf16>
    tpu.vector_store %arg3[%c0_3, %c0_4], %3 {strides = array<i32>} : memref<128x128xbf16, #tpu.memory_space<vmem>>, vector<128x128xbf16>,
    return
  }
  func.func @transform_0(%arg0: i32) -> (i32, i32) {
    %c0_i32 = arith.constant 0 : i32
    %c0_i32_0 = arith.constant 0 : i32
    return %arg0, %c0_i32 : i32, i32
  }
  func.func @transform_1(%arg0: i32) -> (i32, i32) {
    %c0_i32 = arith.constant 0 : i32
    %c0_i32_0 = arith.constant 0 : i32
    %c0_i32_1 = arith.constant 0 : i32
    return %c0_i32, %c0_i32_0 : i32, i32
  }
  func.func @transform_2(%arg0: i32) -> (i32, i32) {
    %c0_i32 = arith.constant 0 : i32
    %c0_i32_0 = arith.constant 0 : i32
    return %arg0, %c0_i32 : i32, i32
  }
}

module attributes {stable_mosaic.version = 11 : i64} {
  func.func @fused_aggregate_kernel(%arg0: i32, %arg1: i32, %arg2: memref<128x256xbf16, #tpu.memory_space<vmem>>, %arg3: memref<256x128xbf16, #tpu.memory_space<vmem>>, %arg4: memref<1x128xf32, #tpu.memory_space<vmem>>, %arg5: memref<128x128xbf16, #tpu.memory_space<vmem>>, %arg6: memref<128x128xbf16, #tpu.memory_space<vmem>>, %arg7: memref<128x128xf32, #tpu.memory_space<vmem>>) attributes {dimension_semantics = [#tpu.dimension_semantics<parallel>, #tpu.dimension_semantics<arbitrary>], iteration_bounds = array<i64: 2, 1>, scalar_prefetch = 0 : i64, scratch_operands = 1 : i64, tpu.core_type = #tpu.core_type<tc>, window_params = [{transform_indices = @transform_0, window_bounds = array<i64: 128, 256>}, {pipeline_mode = #tpu.pipeline_mode<synchronous>, transform_indices = @transform_1, window_bounds = array<i64: 256, 128>}, {pipeline_mode = #tpu.pipeline_mode<synchronous>, transform_indices = @transform_2, window_bounds = array<i64: 1, 128>}, {pipeline_mode = #tpu.pipeline_mode<synchronous>, transform_indices = @transform_3, window_bounds = array<i64: 128, 128>}, {transform_indices = @transform_4, window_bounds = array<i64: 128, 128>}]} {
    %c0_i32 = arith.constant 0 : i32
    %0 = arith.cmpi eq, %arg1, %c0_i32 : i32
    %1 = arith.extui %0 : i1 to i32
    %c0_i32_0 = arith.constant 0 : i32
    %2 = arith.cmpi ne, %1, %c0_i32_0 : i32
    scf.if %2 {
      %cst_9 = arith.constant 0.000000e+00 : f32
      %15 = vector.broadcast %cst_9 : f32 to vector<128x128xf32>
      %c0_10 = arith.constant 0 : index
      %c0_11 = arith.constant 0 : index
      %16 = vector.load %arg7[%c0_10, %c0_11] : memref<128x128xf32, #tpu.memory_space<vmem>>, vector<128x128xf32>
      tpu.vector_store %arg7[%c0_10, %c0_11], %15 {strides = array<i32>} : memref<128x128xf32, #tpu.memory_space<vmem>>, vector<128x128xf32>,
    } else {
    }
    %c256_i32 = arith.constant 256 : i32
    %3 = arith.muli %arg1, %c256_i32 : i32
    %4 = tpu.assume_multiple %3, 128 : i32
    %5 = arith.index_cast %4 : i32 to index
    %c0 = arith.constant 0 : index
    %6 = vector.load %arg3[%5, %c0] : memref<256x128xbf16, #tpu.memory_space<vmem>>, vector<256x128xbf16>
    %c0_1 = arith.constant 0 : index
    %c0_2 = arith.constant 0 : index
    %7 = vector.load %arg7[%c0_1, %c0_2] : memref<128x128xf32, #tpu.memory_space<vmem>>, vector<128x128xf32>
    %c0_3 = arith.constant 0 : index
    %c0_4 = arith.constant 0 : index
    %8 = vector.load %arg2[%c0_3, %c0_4] : memref<128x256xbf16, #tpu.memory_space<vmem>>, vector<128x256xbf16>
    %cst = arith.constant dense<0.000000e+00> : vector<128x128xf32>
    %9 = tpu.matmul %8, %6, %cst {dimension_numbers = #tpu.dot_dimension_numbers<[1], [0], [0], [1], [0, 0, 1, 1], [], []>} : vector<128x256xbf16>, vector<256x128xbf16>, vector<128x128xf32> -> vector<128x128xf32>
    %10 = arith.addf %7, %9 : vector<128x128xf32>
    %c0_5 = arith.constant 0 : index
    %c0_6 = arith.constant 0 : index
    %11 = vector.load %arg7[%c0_5, %c0_6] : memref<128x128xf32, #tpu.memory_space<vmem>>, vector<128x128xf32>
    tpu.vector_store %arg7[%c0_5, %c0_6], %10 {strides = array<i32>} : memref<128x128xf32, #tpu.memory_space<vmem>>, vector<128x128xf32>,
    %c0_i32_7 = arith.constant 0 : i32
    %12 = arith.cmpi eq, %arg1, %c0_i32_7 : i32
    %13 = arith.extui %12 : i1 to i32
    %c0_i32_8 = arith.constant 0 : i32
    %14 = arith.cmpi ne, %13, %c0_i32_8 : i32
    scf.if %14 {
      %c0_9 = arith.constant 0 : index
      %c0_10 = arith.constant 0 : index
      %15 = vector.load %arg7[%c0_9, %c0_10] : memref<128x128xf32, #tpu.memory_space<vmem>>, vector<128x128xf32>
      %c0_11 = arith.constant 0 : index
      %c0_12 = arith.constant 0 : index
      %16 = vector.load %arg4[%c0_11, %c0_12] : memref<1x128xf32, #tpu.memory_space<vmem>>, vector<1x128xf32>
      %17 = vector.broadcast %16 : vector<1x128xf32> to vector<128x128xf32>
      %18 = arith.addf %15, %17 : vector<128x128xf32>
      %cst_13 = arith.constant 0.000000e+00 : f32
      %19 = vector.broadcast %cst_13 : f32 to vector<128x128xf32>
      %20 = arith.maximumf %18, %19 : vector<128x128xf32>
      %21 = arith.truncf %20 : vector<128x128xf32> to vector<128x128xbf16>
      %c0_14 = arith.constant 0 : index
      %c0_15 = arith.constant 0 : index
      %22 = vector.load %arg5[%c0_14, %c0_15] : memref<128x128xbf16, #tpu.memory_space<vmem>>, vector<128x128xbf16>
      %cst_16 = arith.constant dense<0.000000e+00> : vector<128x128xf32>
      %23 = tpu.matmul %21, %22, %cst_16 {dimension_numbers = #tpu.dot_dimension_numbers<[1], [0], [0], [1], [0, 0, 1, 1], [], []>} : vector<128x128xbf16>, vector<128x128xbf16>, vector<128x128xf32> -> vector<128x128xf32>
      %24 = arith.truncf %23 : vector<128x128xf32> to vector<128x128xbf16>
      %c0_17 = arith.constant 0 : index
      %c0_18 = arith.constant 0 : index
      %25 = vector.load %arg6[%c0_17, %c0_18] : memref<128x128xbf16, #tpu.memory_space<vmem>>, vector<128x128xbf16>
      tpu.vector_store %arg6[%c0_17, %c0_18], %24 {strides = array<i32>} : memref<128x128xbf16, #tpu.memory_space<vmem>>, vector<128x128xbf16>,
    } else {
    }
    return
  }
  func.func @transform_0(%arg0: i32, %arg1: i32) -> (i32, i32) {
    %c0_i32 = arith.constant 0 : i32
    return %arg0, %arg1 : i32, i32
  }
  func.func @transform_1(%arg0: i32, %arg1: i32) -> (i32, i32) {
    %c0_i32 = arith.constant 0 : i32
    %c0_i32_0 = arith.constant 0 : i32
    %c0_i32_1 = arith.constant 0 : i32
    return %c0_i32, %c0_i32_0 : i32, i32
  }
  func.func @transform_2(%arg0: i32, %arg1: i32) -> (i32, i32) {
    %c0_i32 = arith.constant 0 : i32
    %c0_i32_0 = arith.constant 0 : i32
    %c0_i32_1 = arith.constant 0 : i32
    return %c0_i32, %c0_i32_0 : i32, i32
  }
  func.func @transform_3(%arg0: i32, %arg1: i32) -> (i32, i32) {
    %c0_i32 = arith.constant 0 : i32
    %c0_i32_0 = arith.constant 0 : i32
    %c0_i32_1 = arith.constant 0 : i32
    return %c0_i32, %c0_i32_0 : i32, i32
  }
  func.func @transform_4(%arg0: i32, %arg1: i32) -> (i32, i32) {
    %c0_i32 = arith.constant 0 : i32
    %c0_i32_0 = arith.constant 0 : i32
    return %arg0, %c0_i32 : i32, i32
  }
}

module attributes {stable_mosaic.version = 11 : i64} {
  func.func @aggregate_kernel(%arg0: i32, %arg1: i32, %arg2: memref<128x256xbf16, #tpu.memory_space<vmem>>, %arg3: memref<256x128xbf16, #tpu.memory_space<vmem>>, %arg4: memref<1x128xf32, #tpu.memory_space<vmem>>, %arg5: memref<128x128xf32, #tpu.memory_space<vmem>>) attributes {dimension_semantics = [#tpu.dimension_semantics<parallel>, #tpu.dimension_semantics<arbitrary>], iteration_bounds = array<i64: 2, 1>, scalar_prefetch = 0 : i64, scratch_operands = 0 : i64, tpu.core_type = #tpu.core_type<tc>, window_params = [{transform_indices = @transform_0, window_bounds = array<i64: 128, 256>}, {pipeline_mode = #tpu.pipeline_mode<synchronous>, transform_indices = @transform_1, window_bounds = array<i64: 256, 128>}, {pipeline_mode = #tpu.pipeline_mode<synchronous>, transform_indices = @transform_2, window_bounds = array<i64: 1, 128>}, {transform_indices = @transform_3, window_bounds = array<i64: 128, 128>}]} {
    %c0_i32 = arith.constant 0 : i32
    %0 = arith.cmpi eq, %arg1, %c0_i32 : i32
    %1 = arith.extui %0 : i1 to i32
    %c0_i32_0 = arith.constant 0 : i32
    %2 = arith.cmpi ne, %1, %c0_i32_0 : i32
    scf.if %2 {
      %cst_9 = arith.constant 0.000000e+00 : f32
      %15 = vector.broadcast %cst_9 : f32 to vector<128x128xf32>
      %c0_10 = arith.constant 0 : index
      %c0_11 = arith.constant 0 : index
      %16 = vector.load %arg5[%c0_10, %c0_11] : memref<128x128xf32, #tpu.memory_space<vmem>>, vector<128x128xf32>
      tpu.vector_store %arg5[%c0_10, %c0_11], %15 {strides = array<i32>} : memref<128x128xf32, #tpu.memory_space<vmem>>, vector<128x128xf32>,
    } else {
    }
    %c256_i32 = arith.constant 256 : i32
    %3 = arith.muli %arg1, %c256_i32 : i32
    %4 = tpu.assume_multiple %3, 128 : i32
    %5 = arith.index_cast %4 : i32 to index
    %c0 = arith.constant 0 : index
    %6 = vector.load %arg3[%5, %c0] : memref<256x128xbf16, #tpu.memory_space<vmem>>, vector<256x128xbf16>
    %c0_1 = arith.constant 0 : index
    %c0_2 = arith.constant 0 : index
    %7 = vector.load %arg5[%c0_1, %c0_2] : memref<128x128xf32, #tpu.memory_space<vmem>>, vector<128x128xf32>
    %c0_3 = arith.constant 0 : index
    %c0_4 = arith.constant 0 : index
    %8 = vector.load %arg2[%c0_3, %c0_4] : memref<128x256xbf16, #tpu.memory_space<vmem>>, vector<128x256xbf16>
    %cst = arith.constant dense<0.000000e+00> : vector<128x128xf32>
    %9 = tpu.matmul %8, %6, %cst {dimension_numbers = #tpu.dot_dimension_numbers<[1], [0], [0], [1], [0, 0, 1, 1], [], []>} : vector<128x256xbf16>, vector<256x128xbf16>, vector<128x128xf32> -> vector<128x128xf32>
    %10 = arith.addf %7, %9 : vector<128x128xf32>
    %c0_5 = arith.constant 0 : index
    %c0_6 = arith.constant 0 : index
    %11 = vector.load %arg5[%c0_5, %c0_6] : memref<128x128xf32, #tpu.memory_space<vmem>>, vector<128x128xf32>
    tpu.vector_store %arg5[%c0_5, %c0_6], %10 {strides = array<i32>} : memref<128x128xf32, #tpu.memory_space<vmem>>, vector<128x128xf32>,
    %c0_i32_7 = arith.constant 0 : i32
    %12 = arith.cmpi eq, %arg1, %c0_i32_7 : i32
    %13 = arith.extui %12 : i1 to i32
    %c0_i32_8 = arith.constant 0 : i32
    %14 = arith.cmpi ne, %13, %c0_i32_8 : i32
    scf.if %14 {
      %c0_9 = arith.constant 0 : index
      %c0_10 = arith.constant 0 : index
      %15 = vector.load %arg5[%c0_9, %c0_10] : memref<128x128xf32, #tpu.memory_space<vmem>>, vector<128x128xf32>
      %c0_11 = arith.constant 0 : index
      %c0_12 = arith.constant 0 : index
      %16 = vector.load %arg4[%c0_11, %c0_12] : memref<1x128xf32, #tpu.memory_space<vmem>>, vector<1x128xf32>
      %17 = vector.broadcast %16 : vector<1x128xf32> to vector<128x128xf32>
      %18 = arith.addf %15, %17 : vector<128x128xf32>
      %c0_13 = arith.constant 0 : index
      %c0_14 = arith.constant 0 : index
      %19 = vector.load %arg5[%c0_13, %c0_14] : memref<128x128xf32, #tpu.memory_space<vmem>>, vector<128x128xf32>
      tpu.vector_store %arg5[%c0_13, %c0_14], %18 {strides = array<i32>} : memref<128x128xf32, #tpu.memory_space<vmem>>, vector<128x128xf32>,
    } else {
    }
    return
  }
  func.func @transform_0(%arg0: i32, %arg1: i32) -> (i32, i32) {
    %c0_i32 = arith.constant 0 : i32
    return %arg0, %arg1 : i32, i32
  }
  func.func @transform_1(%arg0: i32, %arg1: i32) -> (i32, i32) {
    %c0_i32 = arith.constant 0 : i32
    %c0_i32_0 = arith.constant 0 : i32
    %c0_i32_1 = arith.constant 0 : i32
    return %c0_i32, %c0_i32_0 : i32, i32
  }
  func.func @transform_2(%arg0: i32, %arg1: i32) -> (i32, i32) {
    %c0_i32 = arith.constant 0 : i32
    %c0_i32_0 = arith.constant 0 : i32
    %c0_i32_1 = arith.constant 0 : i32
    return %c0_i32, %c0_i32_0 : i32, i32
  }
  func.func @transform_3(%arg0: i32, %arg1: i32) -> (i32, i32) {
    %c0_i32 = arith.constant 0 : i32
    %c0_i32_0 = arith.constant 0 : i32
    return %arg0, %c0_i32 : i32, i32
  }
}

</mosaic_0001>

<bundles_post_ra>
// kernel: gcn_forward.3
= control target key start
LH: loop header
LB: loop body
LE: loop exit
PB: predicated region body
PF: predicated region fallthrough
CT: control target
= control target key end

     0   :  { %s519_s9 = smov 0   ;;  %s547_s0 = inlined_call_operand.vmem [shape: bf16[256,16], index: 0, kind: input, shape index: {}]   ;;  %s548_s1 = inlined_call_operand.vmem [shape: bf16[16,128], index: 1, kind: input, shape index: {}]   ;;  %s549_s2 = inlined_call_operand.vmem [shape: bf16[256,128], index: 2, kind: output, shape index: {}]  }
   0x1 LB: > { %s374_s10 = sadd.s32 4294967295, %s502_s9   ;;  %p378_p0 = scmp.ge.s32.totalorder %s502_s9, 1  ;;  %s502_s9 = sphi %s519_s9, %s12_s9  }
   0x2   : > { %p113_p1 = scmp.lt.s32.totalorder %s502_s9, 3 }
   0x4   : > { %p114_p2 = pnand %p378_p0, %p113_p1 }
   0x5   : > { %s379_s13 = sshll.u32 (!%p114_p2), %s374_s10, 4 }
   0x6   : > { %117 = sbr.rel (%p114_p2) target bundleno = 176 (0xb0), region = 28  ;;  %p136_p3 = scmp.lt.s32.totalorder (!%p114_p2), %s379_s13, 31 }
   0xb   : > { %v437_v0 = vld [vmem:[%s548_s1] sm:$0xff]  ;;  %s551_s13 = smov (!%p136_p3, %s379_s13), 31  ;;  %vm212_vm0 = vcmask 130048  }
   0xc   : > { %244 = vmatpush.bf16.msra.mxu0 %v437_v0  ;;  %485 = vmatpush.bf16.msra.mxu1 %v437_v0  ;;  %s380_s14 = sshll.u32 %s551_s13, 2 }
   0xd   : > { %486 = vmatpush.bf16.msra.mxu2 %v437_v0  ;;  %487 = vmatpush.bf16.msra.mxu3 %v437_v0  ;;  %s139_s17 = scalar_lea.vmem %s547_s0, %s380_s14  ;;  %s145_s20 = scalar_lea.vmem %s549_s2, %s380_s14 }
   0xe   : > { %v429_v1 = vld [vmem:[%s139_s17] sm:$0xff]  ;;  %v431_v2 = vld [vmem:[%s139_s17 + $0x10] sm:$0xff]  ;;  %v430_v5 = vld [vmem:[%s139_s17 + $0x8] sm:$0xff] }
   0xf   : > { %v433_v3 = vld [vmem:[%s139_s17 + $0x20] sm:$0xff]  ;;  %v435_v4 = vld [vmem:[%s139_s17 + $0x30] sm:$0xff]  ;;  %419 = vmatmul.msk.bf16.vlgmr.msra.gmra.mxu0 %vm212_vm0, %v429_v1  ;;  %421 = vmatmul.msk.bf16.vlgmr.msra.gmra.mxu1 %vm212_vm0, %v431_v2  ;;  %v432_v6 = vld [vmem:[%s139_s17 + $0x18] sm:$0xff] }
  0x10   : > { %423 = vmatmul.msk.bf16.vlgmr.msra.gmra.mxu2 %vm212_vm0, %v433_v3  ;;  %425 = vmatmul.msk.bf16.vlgmr.msra.gmra.mxu3 %vm212_vm0, %v435_v4  ;;  %v434_v7 = vld [vmem:[%s139_s17 + $0x28] sm:$0xff]  ;;  %v436_v8 = vld [vmem:[%s139_s17 + $0x38] sm:$0xff] }
  0x1f   : > { %420 = vmatmul.msk.bf16.gmra.mxu0 %vm212_vm0, %v430_v5  ;;  %422 = vmatmul.msk.bf16.gmra.mxu1 %vm212_vm0, %v432_v6 }
  0x20   : > { %424 = vmatmul.msk.bf16.gmra.mxu2 %vm212_vm0, %v434_v7  ;;  %426 = vmatmul.msk.bf16.gmra.mxu3 %vm212_vm0, %v436_v8 }
  0x8c   : > { %v246_v9 = vpop.f32.mrf.mxu0  ;;  %v256_v10 = vpop.f32.mrf.mxu1 }
  0x93   : > { %v266_v11 = vpop.f32.mrf.mxu2  ;;  %v276_v12 = vpop.f32.mrf.mxu3 }
  0x94   : > { %v248_v13 = vpop.f32.mrf.mxu0  ;;  %v258_v14 = vpop.f32.mrf.mxu1 }
  0x95   : > { %v441_v15 = vpack.c.bf16 %v248_v13, %v246_v9  ;;  %v451_v16 = vpack.c.bf16 %v258_v14, %v256_v10 }
  0x97   : > { %442 = vst [vmem:[%s145_s20] sm:$0xff] %v441_v15  }
  0x98   : > { %479 = vst [vmem:[%s145_s20 + $0x10] sm:$0xff] %v451_v16  }
  0x9b   : > { %v268_v17 = vpop.f32.mrf.mxu2  ;;  %v278_v18 = vpop.f32.mrf.mxu3 }
  0x9c   : > { %v461_v19 = vpack.c.bf16 %v268_v17, %v266_v11  ;;  %v471_v20 = vpack.c.bf16 %v278_v18, %v276_v12  ;;  %v251_v21 = vpop.f32.mrf.mxu0  ;;  %v261_v22 = vpop.f32.mrf.mxu1 }
  0x9e   : > { %481 = vst [vmem:[%s145_s20 + $0x20] sm:$0xff] %v461_v19  }
  0x9f   : > { %483 = vst [vmem:[%s145_s20 + $0x30] sm:$0xff] %v471_v20  }
  0xa3   : > { %v271_v23 = vpop.f32.mrf.mxu2  ;;  %v281_v24 = vpop.f32.mrf.mxu3 }
  0xa4   : > { %v253_v25 = vpop.f32.mrf.mxu0  ;;  %v263_v26 = vpop.f32.mrf.mxu1 }
  0xa5   : > { %v446_v27 = vpack.c.bf16 %v253_v25, %v251_v21  ;;  %v456_v28 = vpack.c.bf16 %v263_v26, %v261_v22 }
  0xa7   : > { %478 = vst [vmem:[%s145_s20 + $0x8] sm:$0xff] %v446_v27  }
  0xa8   : > { %480 = vst [vmem:[%s145_s20 + $0x18] sm:$0xff] %v456_v28  }
  0xab   : > { %v273_v29 = vpop.f32.mrf.mxu2  ;;  %v283_v30 = vpop.f32.mrf.mxu3 }
  0xac   : > { %v466_v31 = vpack.c.bf16 %v273_v29, %v271_v23  ;;  %v476_v32 = vpack.c.bf16 %v283_v30, %v281_v24 }
  0xae   : > { %482 = vst [vmem:[%s145_s20 + $0x28] sm:$0xff] %v466_v31  }
  0xaf   : > { %484 = vst [vmem:[%s145_s20 + $0x38] sm:$0xff] %v476_v32  }
  0xb0 PF: > { %s12_s9 = sadd.s32 1, %s502_s9  }
  0xb1   : > { %p9_p4 = scmp.ge.s32.totalorder %s12_s9, 4  }
  0xb3   :  { %11 = sbr.rel (!%p9_p4) target bundleno = 1 (0x1), region = 58 }

// kernel: gcn_forward.5
= control target key start
LH: loop header
LB: loop body
LE: loop exit
PB: predicated region body
PF: predicated region fallthrough
CT: control target
= control target key end

     0   :  { %s987_s12 = smov 0   ;;  %s989_s13 = smov 0   ;;  %s1151_s0 = inlined_call_operand.vmem [shape: bf16[256,256], index: 0, kind: input, shape index: {}]   ;;  %s1152_s1 = inlined_call_operand.vmem [shape: bf16[256,128], index: 1, kind: input, shape index: {}]   ;;  %s1153_s2 = inlined_call_operand.vmem [shape: f32[1,128], index: 2, kind: input, shape index: {}]   ;;  %s1154_s3 = inlined_call_operand.vmem [shape: f32[256,128], index: 3, kind: output, shape index: {}]  }
   0x1   :  { %s991_s14 = smov 0  }
   0x2 LB: > { %s25_s15 = sadd.s32 1, %s961_s13  ;;  %p732_p0 = scmp.ge.s32.totalorder %s965_s14, 1  ;;  %s965_s14 = sphi %s991_s14, %s13_s14   ;;  %s961_s13 = sphi %s989_s13, %s1156_s13   ;;  %s957_s12 = sphi %s987_s12, %s1155_s12  }
   0x3   : > { %p27_p1 = scmp.ge.s32.totalorder %s25_s15, 2  ;;  %p158_p2 = scmp.lt.s32.totalorder %s965_s14, 3 }
   0x5   : > { %s1158_s15 = smov (%p27_p1, %s25_s15), 0  ;;  %p159_p3 = pnand %p732_p0, %p158_p2 }
   0x6   : > { %s733_s28 = sshll.u32 (!%p159_p3), %s957_s12, 4 }
   0x7   : > { %162 = sbr.rel (%p159_p3) target bundleno = 238 (0xee), region = 32  ;;  %p189_p4 = scmp.lt.s32.totalorder (!%p159_p3), %s733_s28, 31 }
   0xc   : > { %v876_v0 = vld [vmem:[%s1152_s1 + $0x38] sm:$0xff]  ;;  %v875_v2 = vld [vmem:[%s1152_s1 + $0x30] sm:$0xff]  ;;  %v874_v4 = vld [vmem:[%s1152_s1 + $0x28] sm:$0xff]  ;;  %s1160_s28 = smov (!%p189_p4, %s733_s28), 31 }
   0xd   : > { %v884_v1 = vld [vmem:[%s1152_s1 + $0x78] sm:$0xff]  ;;  %470 = vmatpush.bf16.msra.mxu0 %v876_v0  ;;  %901 = vmatpush.bf16.msra.mxu2 %v876_v0  ;;  %v883_v3 = vld [vmem:[%s1152_s1 + $0x70] sm:$0xff]  ;;  %v882_v5 = vld [vmem:[%s1152_s1 + $0x68] sm:$0xff]  ;;  %s868_s17 = sshll.u32 %s1160_s28, 3 }
   0xe   : > { %519 = vmatpush.bf16.msra.mxu1 %v884_v1  ;;  %909 = vmatpush.bf16.msra.mxu3 %v884_v1  ;;  %v873_v6 = vld [vmem:[%s1152_s1 + $0x20] sm:$0xff]  ;;  %v872_v8 = vld [vmem:[%s1152_s1 + $0x18] sm:$0xff]  ;;  %v871_v10 = vld [vmem:[%s1152_s1 + $0x10] sm:$0xff]  ;;  %s1055_s22 = scalar_lea.vmem %s1151_s0, %s868_s17  ;;  %s1108_s7 = scalar_lea.vmem %s1154_s3, %s868_s17 }
   0xf   : > { %v881_v7 = vld [vmem:[%s1152_s1 + $0x60] sm:$0xff]  ;;  %v880_v9 = vld [vmem:[%s1152_s1 + $0x58] sm:$0xff]  ;;  %v879_v11 = vld [vmem:[%s1152_s1 + $0x50] sm:$0xff] }
  0x10   : > { %v870_v12 = vld [vmem:[%s1152_s1 + $0x8] sm:$0xff]  ;;  %v869_v14 = vld [vmem:[%s1152_s1] sm:$0xff]  ;;  %v748_v28 = vld [vmem:[%s1055_s22 + $0x10] sm:$0xf] }
  0x11   : > { %471 = vmatpush.bf16.msra.mxu0 %v875_v2  ;;  %902 = vmatpush.bf16.msra.mxu2 %v875_v2  ;;  %v878_v13 = vld [vmem:[%s1152_s1 + $0x48] sm:$0xff]  ;;  %v877_v15 = vld [vmem:[%s1152_s1 + $0x40] sm:$0xff]  ;;  %v888_v29 = vld [vmem:[%s1055_s22 + $0x14] sm:$0xf0] }
  0x12   : > { %520 = vmatpush.bf16.msra.mxu1 %v883_v3  ;;  %910 = vmatpush.bf16.msra.mxu3 %v883_v3  ;;  %v740_v16 = vld [vmem:[%s1055_s22] sm:$0xf]  ;;  %v886_v17 = vld [vmem:[%s1055_s22 + $0x4] sm:$0xf0]  ;;  %v885_v20 = vld [vmem:[%s1055_s22 + $0x4] sm:$0xf]  ;;  %v749_v36 = vor.u32 %v888_v29, %v748_v28 }
  0x13   : > { %v772_v18 = vld [vmem:[%s1055_s22 + $0x40] sm:$0xf]  ;;  %v894_v19 = vld [vmem:[%s1055_s22 + $0x44] sm:$0xf0]  ;;  %v742_v21 = vld [vmem:[%s1055_s22 + $0x8] sm:$0xf0]  ;;  %v741_v24 = vor.u32 %v886_v17, %v740_v16 }
  0x14   : > { %v893_v22 = vld [vmem:[%s1055_s22 + $0x44] sm:$0xf]  ;;  %v774_v23 = vld [vmem:[%s1055_s22 + $0x48] sm:$0xf0]  ;;  %v773_v25 = vor.u32 %v894_v19, %v772_v18  ;;  %v745_v26 = vor.u32 %v885_v20, %v742_v21  ;;  %v780_v30 = vld [vmem:[%s1055_s22 + $0x50] sm:$0xf] }
  0x15   : > { %472 = vmatpush.bf16.msra.mxu0 %v874_v4  ;;  %903 = vmatpush.bf16.msra.mxu2 %v874_v4  ;;  %v777_v27 = vor.u32 %v893_v22, %v774_v23  ;;  %v896_v31 = vld [vmem:[%s1055_s22 + $0x54] sm:$0xf0]  ;;  %v887_v32 = vld [vmem:[%s1055_s22 + $0x14] sm:$0xf]  ;;  %v750_v33 = vld [vmem:[%s1055_s22 + $0x18] sm:$0xf0] }
  0x16   : > { %521 = vmatpush.bf16.msra.mxu1 %v882_v5  ;;  %911 = vmatpush.bf16.msra.mxu3 %v882_v5  ;;  %v895_v34 = vld [vmem:[%s1055_s22 + $0x54] sm:$0xf]  ;;  %v782_v35 = vld [vmem:[%s1055_s22 + $0x58] sm:$0xf0]  ;;  %v781_v37 = vor.u32 %v896_v31, %v780_v30  ;;  %v753_v38 = vor.u32 %v887_v32, %v750_v33  ;;  %v756_v40 = vld [vmem:[%s1055_s22 + $0x20] sm:$0xf] }
  0x17   : > { %v785_v39 = vor.u32 %v895_v34, %v782_v35  ;;  %v890_v41 = vld [vmem:[%s1055_s22 + $0x24] sm:$0xf0]  ;;  %v788_v42 = vld [vmem:[%s1055_s22 + $0x60] sm:$0xf]  ;;  %v889_v44 = vld [vmem:[%s1055_s22 + $0x24] sm:$0xf] }
  0x18   : > { %v898_v43 = vld [vmem:[%s1055_s22 + $0x64] sm:$0xf0]  ;;  %v758_v45 = vld [vmem:[%s1055_s22 + $0x28] sm:$0xf0]  ;;  %v897_v46 = vld [vmem:[%s1055_s22 + $0x64] sm:$0xf]  ;;  %v757_v48 = vor.u32 %v890_v41, %v756_v40 }
  0x19   : > { %473 = vmatpush.bf16.msra.mxu0 %v873_v6  ;;  %904 = vmatpush.bf16.msra.mxu2 %v873_v6  ;;  %v790_v47 = vld [vmem:[%s1055_s22 + $0x68] sm:$0xf0]  ;;  %v789_v49 = vor.u32 %v898_v43, %v788_v42  ;;  %v761_v50 = vor.u32 %v889_v44, %v758_v45  ;;  %v764_v52 = vld [vmem:[%s1055_s22 + $0x30] sm:$0xf]  ;;  %v892_v53 = vld [vmem:[%s1055_s22 + $0x34] sm:$0xf0] }
  0x1a   : > { %522 = vmatpush.bf16.msra.mxu1 %v881_v7  ;;  %912 = vmatpush.bf16.msra.mxu3 %v881_v7  ;;  %v793_v51 = vor.u32 %v897_v46, %v790_v47  ;;  %v796_v54 = vld [vmem:[%s1055_s22 + $0x70] sm:$0xf]  ;;  %v900_v55 = vld [vmem:[%s1055_s22 + $0x74] sm:$0xf0]  ;;  %v891_v56 = vld [vmem:[%s1055_s22 + $0x34] sm:$0xf]  ;;  %v765_v60 = vor.u32 %v892_v53, %v764_v52 }
  0x1b   : > { %v766_v57 = vld [vmem:[%s1055_s22 + $0x38] sm:$0xf0]  ;;  %v899_v58 = vld [vmem:[%s1055_s22 + $0x74] sm:$0xf]  ;;  %v797_v61 = vor.u32 %v900_v55, %v796_v54  ;;  %v1101_v3 = vld [vmem:[%s1153_s2] ss:$0 sm:$0xff] }
  0x1c   : > { %v798_v59 = vld [vmem:[%s1055_s22 + $0x78] sm:$0xf0]  ;;  %v769_v62 = vor.u32 %v891_v56, %v766_v57 }
  0x1d   : > { %474 = vmatpush.bf16.msra.mxu0 %v872_v8  ;;  %905 = vmatpush.bf16.msra.mxu2 %v872_v8  ;;  %v801_v63 = vor.u32 %v899_v58, %v798_v59 }
  0x1e   : > { %523 = vmatpush.bf16.msra.mxu1 %v880_v9  ;;  %913 = vmatpush.bf16.msra.mxu3 %v880_v9 }
  0x21   : > { %475 = vmatpush.bf16.msra.mxu0 %v871_v10  ;;  %906 = vmatpush.bf16.msra.mxu2 %v871_v10 }
  0x22   : > { %524 = vmatpush.bf16.msra.mxu1 %v879_v11  ;;  %914 = vmatpush.bf16.msra.mxu3 %v879_v11 }
  0x25   : > { %476 = vmatpush.bf16.msra.mxu0 %v870_v12  ;;  %907 = vmatpush.bf16.msra.mxu2 %v870_v12 }
  0x26   : > { %525 = vmatpush.bf16.msra.mxu1 %v878_v13  ;;  %915 = vmatpush.bf16.msra.mxu3 %v878_v13 }
  0x29   : > { %477 = vmatpush.bf16.msra.mxu0 %v869_v14  ;;  %908 = vmatpush.bf16.msra.mxu2 %v869_v14 }
  0x2a   : > { %526 = vmatpush.bf16.msra.mxu1 %v877_v15  ;;  %916 = vmatpush.bf16.msra.mxu3 %v877_v15 }
  0x2c   : > { %478 = vmatmul.bf16.vlgmr.msra.gmra.mxu0 %v741_v24  ;;  %498 = vmatmul.bf16.vlgmr.msra.gmra.mxu2 %v773_v25 }
  0x2d   : > { %527 = vmatmul.bf16.vlgmr.msra.gmra.mxu1 %v745_v26  ;;  %547 = vmatmul.bf16.vlgmr.msra.gmra.mxu3 %v777_v27 }
  0x3c   : > { %483 = vmatmul.bf16.gmra.mxu0 %v749_v36  ;;  %503 = vmatmul.bf16.gmra.mxu2 %v781_v37 }
  0x3d   : > { %532 = vmatmul.bf16.gmra.mxu1 %v753_v38  ;;  %552 = vmatmul.bf16.gmra.mxu3 %v785_v39 }
  0x4c   : > { %488 = vmatmul.bf16.gmra.mxu0 %v757_v48  ;;  %508 = vmatmul.bf16.gmra.mxu2 %v789_v49 }
  0x4d   : > { %537 = vmatmul.bf16.gmra.mxu1 %v761_v50  ;;  %557 = vmatmul.bf16.gmra.mxu3 %v793_v51 }
  0x5c   : > { %493 = vmatmul.bf16.gmra.mxu0 %v765_v60  ;;  %513 = vmatmul.bf16.gmra.mxu2 %v797_v61 }
  0x5d   : > { %542 = vmatmul.bf16.gmra.mxu1 %v769_v62  ;;  %562 = vmatmul.bf16.gmra.mxu3 %v801_v63 }
  0xa9   : > { %v479_v0 = vpop.f32.mrf.mxu0 }
  0xaa   : > { %v528_v1 = vpop.f32.mrf.mxu1 }
  0xab   : > { %v529_v2 = vadd.f32 %v528_v1, %v479_v0 }
  0xad   : > { %v623_v4 = vadd.f32 %v1101_v3, %v529_v2 }
  0xaf   : > { %v499_v5 = vpop.f32.mrf.mxu2  ;;  %639 = vst [vmem:[%s1108_s7] sm:$0xff] %v623_v4 }
  0xb0   : > { %v548_v6 = vpop.f32.mrf.mxu3 }
  0xb1   : > { %v549_v7 = vadd.f32 %v548_v6, %v499_v5  ;;  %v481_v8 = vpop.f32.mrf.mxu0 }
  0xb2   : > { %v530_v9 = vpop.f32.mrf.mxu1 }
  0xb3   : > { %v531_v10 = vadd.f32 %v530_v9, %v481_v8  ;;  %v631_v11 = vadd.f32 %v1101_v3, %v549_v7 }
  0xb5   : > { %647 = vst [vmem:[%s1108_s7 + $0x40] sm:$0xff] %v631_v11  ;;  %v624_v12 = vadd.f32 %v1101_v3, %v531_v10 }
  0xb7   : > { %v501_v13 = vpop.f32.mrf.mxu2  ;;  %640 = vst [vmem:[%s1108_s7 + $0x8] sm:$0xff] %v624_v12 }
  0xb8   : > { %v550_v14 = vpop.f32.mrf.mxu3 }
  0xb9   : > { %v551_v15 = vadd.f32 %v550_v14, %v501_v13  ;;  %v484_v16 = vpop.f32.mrf.mxu0 }
  0xba   : > { %v533_v17 = vpop.f32.mrf.mxu1 }
  0xbb   : > { %v534_v18 = vadd.f32 %v533_v17, %v484_v16  ;;  %v632_v19 = vadd.f32 %v1101_v3, %v551_v15 }
  0xbd   : > { %648 = vst [vmem:[%s1108_s7 + $0x48] sm:$0xff] %v632_v19  ;;  %v625_v20 = vadd.f32 %v1101_v3, %v534_v18 }
  0xbf   : > { %v504_v21 = vpop.f32.mrf.mxu2  ;;  %641 = vst [vmem:[%s1108_s7 + $0x10] sm:$0xff] %v625_v20 }
  0xc0   : > { %v553_v22 = vpop.f32.mrf.mxu3 }
  0xc1   : > { %v554_v23 = vadd.f32 %v553_v22, %v504_v21  ;;  %v486_v24 = vpop.f32.mrf.mxu0 }
  0xc2   : > { %v535_v25 = vpop.f32.mrf.mxu1 }
  0xc3   : > { %v536_v26 = vadd.f32 %v535_v25, %v486_v24  ;;  %v633_v27 = vadd.f32 %v1101_v3, %v554_v23 }
  0xc5   : > { %649 = vst [vmem:[%s1108_s7 + $0x50] sm:$0xff] %v633_v27  ;;  %v626_v28 = vadd.f32 %v1101_v3, %v536_v26 }
  0xc7   : > { %v506_v29 = vpop.f32.mrf.mxu2  ;;  %642 = vst [vmem:[%s1108_s7 + $0x18] sm:$0xff] %v626_v28 }
  0xc8   : > { %v555_v30 = vpop.f32.mrf.mxu3 }
  0xc9   : > { %v556_v31 = vadd.f32 %v555_v30, %v506_v29  ;;  %v489_v32 = vpop.f32.mrf.mxu0 }
  0xca   : > { %v538_v33 = vpop.f32.mrf.mxu1 }
  0xcb   : > { %v539_v34 = vadd.f32 %v538_v33, %v489_v32  ;;  %v634_v35 = vadd.f32 %v1101_v3, %v556_v31 }
  0xcd   : > { %650 = vst [vmem:[%s1108_s7 + $0x58] sm:$0xff] %v634_v35  ;;  %v627_v36 = vadd.f32 %v1101_v3, %v539_v34 }
  0xcf   : > { %v509_v37 = vpop.f32.mrf.mxu2  ;;  %643 = vst [vmem:[%s1108_s7 + $0x20] sm:$0xff] %v627_v36 }
  0xd0   : > { %v558_v38 = vpop.f32.mrf.mxu3 }
  0xd1   : > { %v559_v39 = vadd.f32 %v558_v38, %v509_v37  ;;  %v491_v40 = vpop.f32.mrf.mxu0 }
  0xd2   : > { %v540_v41 = vpop.f32.mrf.mxu1 }
  0xd3   : > { %v541_v42 = vadd.f32 %v540_v41, %v491_v40  ;;  %v635_v43 = vadd.f32 %v1101_v3, %v559_v39 }
  0xd5   : > { %651 = vst [vmem:[%s1108_s7 + $0x60] sm:$0xff] %v635_v43  ;;  %v628_v44 = vadd.f32 %v1101_v3, %v541_v42 }
  0xd7   : > { %v511_v45 = vpop.f32.mrf.mxu2  ;;  %644 = vst [vmem:[%s1108_s7 + $0x28] sm:$0xff] %v628_v44 }
  0xd8   : > { %v560_v46 = vpop.f32.mrf.mxu3 }
  0xd9   : > { %v561_v47 = vadd.f32 %v560_v46, %v511_v45  ;;  %v494_v48 = vpop.f32.mrf.mxu0 }
  0xda   : > { %v543_v49 = vpop.f32.mrf.mxu1 }
  0xdb   : > { %v544_v50 = vadd.f32 %v543_v49, %v494_v48  ;;  %v636_v51 = vadd.f32 %v1101_v3, %v561_v47 }
  0xdd   : > { %652 = vst [vmem:[%s1108_s7 + $0x68] sm:$0xff] %v636_v51  ;;  %v629_v52 = vadd.f32 %v1101_v3, %v544_v50 }
  0xdf   : > { %v514_v53 = vpop.f32.mrf.mxu2  ;;  %645 = vst [vmem:[%s1108_s7 + $0x30] sm:$0xff] %v629_v52 }
  0xe0   : > { %v563_v54 = vpop.f32.mrf.mxu3 }
  0xe1   : > { %v564_v55 = vadd.f32 %v563_v54, %v514_v53  ;;  %v496_v56 = vpop.f32.mrf.mxu0 }
  0xe2   : > { %v545_v57 = vpop.f32.mrf.mxu1 }
  0xe3   : > { %v546_v58 = vadd.f32 %v545_v57, %v496_v56  ;;  %v637_v59 = vadd.f32 %v1101_v3, %v564_v55 }
  0xe5   : > { %653 = vst [vmem:[%s1108_s7 + $0x70] sm:$0xff] %v637_v59  ;;  %v630_v60 = vadd.f32 %v1101_v3, %v546_v58 }
  0xe7   : > { %v516_v61 = vpop.f32.mrf.mxu2  ;;  %646 = vst [vmem:[%s1108_s7 + $0x38] sm:$0xff] %v630_v60 }
  0xe8   : > { %v565_v62 = vpop.f32.mrf.mxu3 }
  0xe9   : > { %v566_v63 = vadd.f32 %v565_v62, %v516_v61 }
  0xeb   : > { %v638_v0 = vadd.f32 %v1101_v3, %v566_v63 }
  0xed   : > { %654 = vst [vmem:[%s1108_s7 + $0x78] sm:$0xff] %v638_v0 }
  0xee PF: > { %s13_s14 = sadd.s32 1, %s965_s14   ;;  %s1155_s12 = smov %s961_s13 }
  0xef   : > { %p10_p5 = scmp.ge.s32.totalorder %s13_s14, 4   ;;  %s1156_s13 = smov %s1158_s15 }
  0xf1   :  { %12 = sbr.rel (!%p10_p5) target bundleno = 2 (0x2), region = 71 }

// kernel: gcn_forward.4
= control target key start
LH: loop header
LB: loop body
LE: loop exit
PB: predicated region body
PF: predicated region fallthrough
CT: control target
= control target key end

     0   :  { %s1266_s15 = smov 0   ;;  %s1268_s16 = smov 0   ;;  %s1443_s0 = inlined_call_operand.vmem [shape: bf16[256,256], index: 0, kind: input, shape index: {}]   ;;  %s1444_s1 = inlined_call_operand.vmem [shape: bf16[256,128], index: 1, kind: input, shape index: {}]   ;;  %s1445_s2 = inlined_call_operand.vmem [shape: f32[1,128], index: 2, kind: input, shape index: {}]   ;;  %s1446_s3 = inlined_call_operand.vmem [shape: bf16[128,128], index: 3, kind: input, shape index: {}]   ;;  %s1447_s4 = inlined_call_operand.vmem [shape: bf16[256,128], index: 4, kind: output, shape index: {}]  }
   0x1   :  { %s1270_s17 = smov 0  }
   0x2 LB: > { %s26_s18 = sadd.s32 1, %s1235_s16  ;;  %p912_p0 = scmp.ge.s32.totalorder %s1239_s17, 1  ;;  %s1239_s17 = sphi %s1270_s17, %s14_s17   ;;  %s1235_s16 = sphi %s1268_s16, %s1449_s16   ;;  %s1231_s15 = sphi %s1266_s15, %s1448_s15  }
   0x3   : > { %p28_p1 = scmp.ge.s32.totalorder %s26_s18, 2  ;;  %p183_p2 = scmp.lt.s32.totalorder %s1239_s17, 3 }
   0x5   : > { %s1451_s18 = smov (%p28_p1, %s26_s18), 0  ;;  %p184_p3 = pnand %p912_p0, %p183_p2 }
   0x6   : > { %s913_s5 = sshll.u32 (!%p184_p3), %s1231_s15, 4 }
   0x7   : > { %187 = sbr.rel (%p184_p3) target bundleno = 410 (0x19a), region = 36  ;;  %p216_p4 = scmp.lt.s32.totalorder (!%p184_p3), %s913_s5, 31 }
   0xc   : > { %v1088_v0 = vld [vmem:[%s1444_s1 + $0x38] sm:$0xff]  ;;  %v1087_v2 = vld [vmem:[%s1444_s1 + $0x30] sm:$0xff]  ;;  %v1086_v4 = vld [vmem:[%s1444_s1 + $0x28] sm:$0xff]  ;;  %s1453_s5 = smov (!%p216_p4, %s913_s5), 31 }
   0xd   : > { %v1096_v1 = vld [vmem:[%s1444_s1 + $0x78] sm:$0xff]  ;;  %497 = vmatpush.bf16.msra.mxu0 %v1088_v0  ;;  %1168 = vmatpush.bf16.msra.mxu3 %v1088_v0  ;;  %v1095_v3 = vld [vmem:[%s1444_s1 + $0x70] sm:$0xff]  ;;  %v1094_v5 = vld [vmem:[%s1444_s1 + $0x68] sm:$0xff]  ;;  %s1080_s21 = sshll.u32 %s1453_s5, 3  ;;  %s917_s29 = sshll.u32 %s1453_s5, 2 }
   0xe   : > { %546 = vmatpush.bf16.msra.mxu1 %v1096_v1  ;;  %v1085_v6 = vld [vmem:[%s1444_s1 + $0x20] sm:$0xff]  ;;  %v1084_v8 = vld [vmem:[%s1444_s1 + $0x18] sm:$0xff]  ;;  %v1083_v10 = vld [vmem:[%s1444_s1 + $0x10] sm:$0xff]  ;;  %s1332_s26 = scalar_lea.vmem %s1443_s0, %s1080_s21  ;;  %s1424_s7 = scalar_lea.vmem %s1447_s4, %s917_s29 }
   0xf   : > { %v1093_v7 = vld [vmem:[%s1444_s1 + $0x60] sm:$0xff]  ;;  %v1092_v9 = vld [vmem:[%s1444_s1 + $0x58] sm:$0xff]  ;;  %v1091_v11 = vld [vmem:[%s1444_s1 + $0x50] sm:$0xff] }
  0x10   : > { %v1082_v12 = vld [vmem:[%s1444_s1 + $0x8] sm:$0xff]  ;;  %v1081_v14 = vld [vmem:[%s1444_s1] sm:$0xff]  ;;  %v928_v25 = vld [vmem:[%s1332_s26 + $0x10] sm:$0xf] }
  0x11   : > { %498 = vmatpush.bf16.msra.mxu0 %v1087_v2  ;;  %1169 = vmatpush.bf16.msra.mxu3 %v1087_v2  ;;  %v1090_v13 = vld [vmem:[%s1444_s1 + $0x48] sm:$0xff]  ;;  %v920_v15 = vld [vmem:[%s1332_s26] sm:$0xf]  ;;  %v1097_v20 = vld [vmem:[%s1332_s26 + $0x4] sm:$0xf] }
  0x12   : > { %547 = vmatpush.bf16.msra.mxu1 %v1095_v3  ;;  %v1098_v16 = vld [vmem:[%s1332_s26 + $0x4] sm:$0xf0]  ;;  %v968_v17 = vld [vmem:[%s1332_s26 + $0x60] sm:$0xf]  ;;  %v922_v21 = vld [vmem:[%s1332_s26 + $0x8] sm:$0xf0] }
  0x13   : > { %v1110_v18 = vld [vmem:[%s1332_s26 + $0x64] sm:$0xf0]  ;;  %v1089_v19 = vld [vmem:[%s1444_s1 + $0x40] sm:$0xff]  ;;  %v921_v22 = vor.u32 %v1098_v16, %v920_v15  ;;  %v925_v24 = vor.u32 %v1097_v20, %v922_v21  ;;  %v1100_v26 = vld [vmem:[%s1332_s26 + $0x14] sm:$0xf0] }
  0x14   : > { %v969_v23 = vor.u32 %v1110_v18, %v968_v17  ;;  %v976_v27 = vld [vmem:[%s1332_s26 + $0x70] sm:$0xf]  ;;  %v1112_v28 = vld [vmem:[%s1332_s26 + $0x74] sm:$0xf0]  ;;  %v1099_v29 = vld [vmem:[%s1332_s26 + $0x14] sm:$0xf]  ;;  %v929_v31 = vor.u32 %v1100_v26, %v928_v25 }
  0x15   : > { %499 = vmatpush.bf16.msra.mxu0 %v1086_v4  ;;  %1170 = vmatpush.bf16.msra.mxu3 %v1086_v4  ;;  %v930_v30 = vld [vmem:[%s1332_s26 + $0x18] sm:$0xf0]  ;;  %v977_v32 = vor.u32 %v1112_v28, %v976_v27  ;;  %v936_v34 = vld [vmem:[%s1332_s26 + $0x20] sm:$0xf]  ;;  %v1102_v35 = vld [vmem:[%s1332_s26 + $0x24] sm:$0xf0] }
  0x16   : > { %548 = vmatpush.bf16.msra.mxu1 %v1094_v5  ;;  %v933_v33 = vor.u32 %v1099_v29, %v930_v30  ;;  %v1109_v36 = vld [vmem:[%s1332_s26 + $0x64] sm:$0xf]  ;;  %v970_v37 = vld [vmem:[%s1332_s26 + $0x68] sm:$0xf0]  ;;  %v937_v40 = vor.u32 %v1102_v35, %v936_v34  ;;  %v944_v43 = vld [vmem:[%s1332_s26 + $0x30] sm:$0xf] }
  0x17   : > { %v1101_v38 = vld [vmem:[%s1332_s26 + $0x24] sm:$0xf]  ;;  %v938_v39 = vld [vmem:[%s1332_s26 + $0x28] sm:$0xf0]  ;;  %v973_v41 = vor.u32 %v1109_v36, %v970_v37  ;;  %v1104_v44 = vld [vmem:[%s1332_s26 + $0x34] sm:$0xf0] }
  0x18   : > { %v941_v42 = vor.u32 %v1101_v38, %v938_v39  ;;  %v1111_v45 = vld [vmem:[%s1332_s26 + $0x74] sm:$0xf]  ;;  %v978_v46 = vld [vmem:[%s1332_s26 + $0x78] sm:$0xf0]  ;;  %v945_v49 = vor.u32 %v1104_v44, %v944_v43  ;;  %v1118_v54 = vld [vmem:[%s1446_s3 + $0x28] sm:$0xff] }
  0x19   : > { %500 = vmatpush.bf16.msra.mxu0 %v1085_v6  ;;  %1171 = vmatpush.bf16.msra.mxu3 %v1085_v6  ;;  %v1103_v47 = vld [vmem:[%s1332_s26 + $0x34] sm:$0xf]  ;;  %v946_v48 = vld [vmem:[%s1332_s26 + $0x38] sm:$0xf0]  ;;  %v981_v50 = vor.u32 %v1111_v45, %v978_v46  ;;  %v952_v55 = vld [vmem:[%s1332_s26 + $0x40] sm:$0xf] }
  0x1a   : > { %549 = vmatpush.bf16.msra.mxu1 %v1093_v7  ;;  %v949_v51 = vor.u32 %v1103_v47, %v946_v48  ;;  %v1120_v52 = vld [vmem:[%s1446_s3 + $0x38] sm:$0xff]  ;;  %v1119_v53 = vld [vmem:[%s1446_s3 + $0x30] sm:$0xff]  ;;  %v1106_v56 = vld [vmem:[%s1332_s26 + $0x44] sm:$0xf0] }
  0x1b   : > { %754 = vmatpush.bf16.msra.mxu2 %v1120_v52  ;;  %v1105_v57 = vld [vmem:[%s1332_s26 + $0x44] sm:$0xf]  ;;  %v954_v58 = vld [vmem:[%s1332_s26 + $0x48] sm:$0xf0]  ;;  %v953_v60 = vor.u32 %v1106_v56, %v952_v55  ;;  %v960_v62 = vld [vmem:[%s1332_s26 + $0x50] sm:$0xf] }
  0x1c   : > { %v1117_v59 = vld [vmem:[%s1446_s3 + $0x20] sm:$0xff]  ;;  %v957_v61 = vor.u32 %v1105_v57, %v954_v58  ;;  %v1108_v63 = vld [vmem:[%s1332_s26 + $0x54] sm:$0xf0]  ;;  %v1107_v0 = vld [vmem:[%s1332_s26 + $0x54] sm:$0xf] }
  0x1d   : > { %501 = vmatpush.bf16.msra.mxu0 %v1084_v8  ;;  %1172 = vmatpush.bf16.msra.mxu3 %v1084_v8  ;;  %v961_v2 = vor.u32 %v1108_v63, %v960_v62  ;;  %v1116_v4 = vld [vmem:[%s1446_s3 + $0x18] sm:$0xff]  ;;  %v1114_v6 = vld [vmem:[%s1446_s3 + $0x8] sm:$0xff] }
  0x1e   : > { %550 = vmatpush.bf16.msra.mxu1 %v1092_v9 }
  0x1f   : > { %755 = vmatpush.bf16.msra.mxu2 %v1119_v53 }
  0x21   : > { %502 = vmatpush.bf16.msra.mxu0 %v1083_v10  ;;  %1173 = vmatpush.bf16.msra.mxu3 %v1083_v10 }
  0x22   : > { %551 = vmatpush.bf16.msra.mxu1 %v1091_v11 }
  0x23   : > { %756 = vmatpush.bf16.msra.mxu2 %v1118_v54 }
  0x25   : > { %503 = vmatpush.bf16.msra.mxu0 %v1082_v12  ;;  %1174 = vmatpush.bf16.msra.mxu3 %v1082_v12 }
  0x26   : > { %552 = vmatpush.bf16.msra.mxu1 %v1090_v13 }
  0x27   : > { %757 = vmatpush.bf16.msra.mxu2 %v1117_v59 }
  0x29   : > { %504 = vmatpush.bf16.msra.mxu0 %v1081_v14  ;;  %1175 = vmatpush.bf16.msra.mxu3 %v1081_v14 }
  0x2a   : > { %553 = vmatpush.bf16.msra.mxu1 %v1089_v19 }
  0x2b   : > { %758 = vmatpush.bf16.msra.mxu2 %v1116_v4 }
  0x2c   : > { %505 = vmatmul.bf16.vlgmr.msra.gmra.mxu0 %v921_v22  ;;  %535 = vmatmul.bf16.vlgmr.msra.gmra.mxu3 %v969_v23 }
  0x2d   : > { %1176 = vmatpush.bf16.msrb.mxu3 %v1096_v1  ;;  %554 = vmatmul.bf16.vlgmr.msra.gmra.mxu1 %v925_v24  ;;  %v962_v1 = vld [vmem:[%s1332_s26 + $0x58] sm:$0xf0] }
  0x31   : > { %1177 = vmatpush.bf16.msrb.mxu3 %v1095_v3  ;;  %v965_v3 = vor.u32 %v1107_v0, %v962_v1 }
  0x35   : > { %1178 = vmatpush.bf16.msrb.mxu3 %v1094_v5  ;;  %v1115_v5 = vld [vmem:[%s1446_s3 + $0x10] sm:$0xff] }
  0x36   : > { %759 = vmatpush.bf16.msra.mxu2 %v1115_v5 }
  0x39   : > { %1179 = vmatpush.bf16.msrb.mxu3 %v1093_v7  ;;  %v1113_v7 = vld [vmem:[%s1446_s3] sm:$0xff] }
  0x3a   : > { %760 = vmatpush.bf16.msra.mxu2 %v1114_v6 }
  0x3c   : > { %510 = vmatmul.bf16.gmra.mxu0 %v929_v31  ;;  %540 = vmatmul.bf16.gmra.mxu3 %v977_v32 }
  0x3d   : > { %1180 = vmatpush.bf16.msrb.mxu3 %v1092_v9  ;;  %559 = vmatmul.bf16.gmra.mxu1 %v933_v33 }
  0x3e   : > { %761 = vmatpush.bf16.msra.mxu2 %v1113_v7 }
  0x41   : > { %1181 = vmatpush.bf16.msrb.mxu3 %v1091_v11  ;;  %v1402_v11 = vld [vmem:[%s1445_s2] ss:$0 sm:$0xff] }
  0x45   : > { %1182 = vmatpush.bf16.msrb.mxu3 %v1090_v13 }
  0x49   : > { %1183 = vmatpush.bf16.msrb.mxu3 %v1089_v19 }
  0x4c   : > { %515 = vmatmul.bf16.gmra.mxu0 %v937_v40  ;;  %584 = vmatmul.bf16.vlgmr.msrb.gmra.mxu3 %v973_v41 }
  0x4d   : > { %564 = vmatmul.bf16.gmra.mxu1 %v941_v42  ;;  %1184 = vmatpush.bf16.msra.mxu3 %v1120_v52 }
  0x51   : > { %1185 = vmatpush.bf16.msra.mxu3 %v1119_v53 }
  0x55   : > { %1186 = vmatpush.bf16.msra.mxu3 %v1118_v54 }
  0x59   : > { %1187 = vmatpush.bf16.msra.mxu3 %v1117_v59 }
  0x5c   : > { %520 = vmatmul.bf16.gmra.mxu0 %v945_v49  ;;  %589 = vmatmul.bf16.gmra.mxu3 %v981_v50 }
  0x5d   : > { %569 = vmatmul.bf16.gmra.mxu1 %v949_v51  ;;  %1188 = vmatpush.bf16.msra.mxu3 %v1116_v4 }
  0x61   : > { %1189 = vmatpush.bf16.msra.mxu3 %v1115_v5 }
  0x65   : > { %1190 = vmatpush.bf16.msra.mxu3 %v1114_v6 }
  0x69   : > { %1191 = vmatpush.bf16.msra.mxu3 %v1113_v7 }
  0x6c   : > { %525 = vmatmul.bf16.gmra.mxu0 %v953_v60 }
  0x6d   : > { %574 = vmatmul.bf16.gmra.mxu1 %v957_v61 }
  0x7c   : > { %530 = vmatmul.bf16.gmra.mxu0 %v961_v2 }
  0x7d   : > { %579 = vmatmul.bf16.gmra.mxu1 %v965_v3 }
  0xa9   : > { %v506_v8 = vpop.f32.mrf.mxu0 }
  0xaa   : > { %v555_v9 = vpop.f32.mrf.mxu1 }
  0xab   : > { %v556_v10 = vadd.f32 %v555_v9, %v506_v8 }
  0xad   : > { %v650_v15 = vadd.f32 %v1402_v11, %v556_v10 }
  0xaf   : > { %v536_v12 = vpop.f32.mrf.mxu3  ;;  %v666_v18 = vmax.f32 %v650_v15, 0.0 }
  0xb1   : > { %v508_v13 = vpop.f32.mrf.mxu0 }
  0xb2   : > { %v557_v14 = vpop.f32.mrf.mxu1 }
  0xb3   : > { %v558_v16 = vadd.f32 %v557_v14, %v508_v13 }
  0xb5   : > { %v651_v17 = vadd.f32 %v1402_v11, %v558_v16 }
  0xb7   : > { %v667_v19 = vmax.f32 %v651_v17, 0.0  ;;  %v538_v20 = vpop.f32.mrf.mxu3 }
  0xb9   : > { %v511_v21 = vpop.f32.mrf.mxu0  ;;  %v682_v22 = vpack.c.bf16 %v667_v19, %v666_v18 }
  0xba   : > { %v560_v23 = vpop.f32.mrf.mxu1 }
  0xbb   : > { %762 = vmatmul.bf16.vlgmr.msra.gmra.mxu2 %v682_v22  ;;  %v561_v24 = vadd.f32 %v560_v23, %v511_v21 }
  0xbd   : > { %v652_v28 = vadd.f32 %v1402_v11, %v561_v24 }
  0xbf   : > { %v541_v25 = vpop.f32.mrf.mxu3  ;;  %v668_v31 = vmax.f32 %v652_v28, 0.0 }
  0xc1   : > { %v513_v26 = vpop.f32.mrf.mxu0 }
  0xc2   : > { %v562_v27 = vpop.f32.mrf.mxu1 }
  0xc3   : > { %v563_v29 = vadd.f32 %v562_v27, %v513_v26 }
  0xc5   : > { %v653_v30 = vadd.f32 %v1402_v11, %v563_v29 }
  0xc7   : > { %v669_v32 = vmax.f32 %v653_v30, 0.0  ;;  %v543_v33 = vpop.f32.mrf.mxu3 }
  0xc9   : > { %v516_v34 = vpop.f32.mrf.mxu0  ;;  %v683_v35 = vpack.c.bf16 %v669_v32, %v668_v31 }
  0xca   : > { %v565_v36 = vpop.f32.mrf.mxu1 }
  0xcb   : > { %767 = vmatmul.bf16.gmra.mxu2 %v683_v35  ;;  %v566_v37 = vadd.f32 %v565_v36, %v516_v34 }
  0xcd   : > { %v654_v41 = vadd.f32 %v1402_v11, %v566_v37 }
  0xcf   : > { %v585_v38 = vpop.f32.mrf.mxu3  ;;  %v670_v45 = vmax.f32 %v654_v41, 0.0 }
  0xd0   : > { %v586_v43 = vadd.f32 %v585_v38, %v536_v12 }
  0xd1   : > { %v518_v39 = vpop.f32.mrf.mxu0 }
  0xd2   : > { %v567_v40 = vpop.f32.mrf.mxu1  ;;  %v662_v48 = vadd.f32 %v1402_v11, %v586_v43 }
  0xd3   : > { %v568_v42 = vadd.f32 %v567_v40, %v518_v39 }
  0xd4   : > { %v678_v54 = vmax.f32 %v662_v48, 0.0 }
  0xd5   : > { %v655_v44 = vadd.f32 %v1402_v11, %v568_v42 }
  0xd7   : > { %v671_v46 = vmax.f32 %v655_v44, 0.0  ;;  %v587_v47 = vpop.f32.mrf.mxu3 }
  0xd8   : > { %v588_v49 = vadd.f32 %v587_v47, %v538_v20 }
  0xd9   : > { %v521_v50 = vpop.f32.mrf.mxu0  ;;  %v684_v51 = vpack.c.bf16 %v671_v46, %v670_v45 }
  0xda   : > { %v663_v52 = vadd.f32 %v1402_v11, %v588_v49  ;;  %v570_v53 = vpop.f32.mrf.mxu1 }
  0xdb   : > { %772 = vmatmul.bf16.gmra.mxu2 %v684_v51  ;;  %v571_v57 = vadd.f32 %v570_v53, %v521_v50 }
  0xdc   : > { %v679_v55 = vmax.f32 %v663_v52, 0.0 }
  0xdd   : > { %v656_v61 = vadd.f32 %v1402_v11, %v571_v57 }
  0xde   : > { %v688_v56 = vpack.c.bf16 %v679_v55, %v678_v54 }
  0xdf   : > { %v590_v58 = vpop.f32.mrf.mxu3  ;;  %v672_v1 = vmax.f32 %v656_v61, 0.0 }
  0xe0   : > { %792 = vmatmul.bf16.vlgmr.msra.gmra.mxu3 %v688_v56  ;;  %v591_v63 = vadd.f32 %v590_v58, %v541_v25 }
  0xe1   : > { %v523_v59 = vpop.f32.mrf.mxu0 }
  0xe2   : > { %v572_v60 = vpop.f32.mrf.mxu1  ;;  %v664_v4 = vadd.f32 %v1402_v11, %v591_v63 }
  0xe3   : > { %v573_v62 = vadd.f32 %v572_v60, %v523_v59 }
  0xe4   : > { %v680_v10 = vmax.f32 %v664_v4, 0.0 }
  0xe5   : > { %v657_v0 = vadd.f32 %v1402_v11, %v573_v62 }
  0xe7   : > { %v673_v2 = vmax.f32 %v657_v0, 0.0  ;;  %v592_v3 = vpop.f32.mrf.mxu3 }
  0xe8   : > { %v593_v5 = vadd.f32 %v592_v3, %v543_v33 }
  0xe9   : > { %v526_v6 = vpop.f32.mrf.mxu0  ;;  %v685_v7 = vpack.c.bf16 %v673_v2, %v672_v1 }
  0xea   : > { %v665_v8 = vadd.f32 %v1402_v11, %v593_v5  ;;  %v575_v9 = vpop.f32.mrf.mxu1 }
  0xeb   : > { %777 = vmatmul.bf16.gmra.mxu2 %v685_v7  ;;  %v576_v14 = vadd.f32 %v575_v9, %v526_v6 }
  0xec   : > { %v681_v12 = vmax.f32 %v665_v8, 0.0 }
  0xed   : > { %v658_v17 = vadd.f32 %v1402_v11, %v576_v14 }
  0xee   : > { %v689_v13 = vpack.c.bf16 %v681_v12, %v680_v10 }
  0xef   : > { %v674_v20 = vmax.f32 %v658_v17, 0.0 }
  0xf0   : > { %797 = vmatmul.bf16.gmra.mxu3 %v689_v13 }
  0xf1   : > { %v528_v15 = vpop.f32.mrf.mxu0 }
  0xf2   : > { %v577_v16 = vpop.f32.mrf.mxu1 }
  0xf3   : > { %v578_v18 = vadd.f32 %v577_v16, %v528_v15 }
  0xf5   : > { %v659_v19 = vadd.f32 %v1402_v11, %v578_v18 }
  0xf7   : > { %v675_v21 = vmax.f32 %v659_v19, 0.0 }
  0xf9   : > { %v531_v22 = vpop.f32.mrf.mxu0  ;;  %v686_v23 = vpack.c.bf16 %v675_v21, %v674_v20 }
  0xfa   : > { %v580_v24 = vpop.f32.mrf.mxu1 }
  0xfb   : > { %782 = vmatmul.bf16.gmra.mxu2 %v686_v23  ;;  %v581_v25 = vadd.f32 %v580_v24, %v531_v22 }
  0xfd   : > { %v660_v28 = vadd.f32 %v1402_v11, %v581_v25 }
  0xff   : > { %v676_v31 = vmax.f32 %v660_v28, 0.0 }
 0x101   : > { %v533_v26 = vpop.f32.mrf.mxu0 }
 0x102   : > { %v582_v27 = vpop.f32.mrf.mxu1 }
 0x103   : > { %v583_v29 = vadd.f32 %v582_v27, %v533_v26 }
 0x105   : > { %v661_v30 = vadd.f32 %v1402_v11, %v583_v29 }
 0x107   : > { %v677_v32 = vmax.f32 %v661_v30, 0.0 }
 0x109   : > { %v687_v33 = vpack.c.bf16 %v677_v32, %v676_v31 }
 0x10b   : > { %787 = vmatmul.bf16.gmra.mxu2 %v687_v33 }
 0x13e   : > { %v763_v34 = vpop.f32.mrf.mxu2 }
 0x146   : > { %v765_v35 = vpop.f32.mrf.mxu2 }
 0x147   : > { %v1124_v36 = vpack.c.bf16 %v765_v35, %v763_v34 }
 0x149   : > { %1125 = vst [vmem:[%s1424_s7] sm:$0xff] %v1124_v36  }
 0x14e   : > { %v768_v37 = vpop.f32.mrf.mxu2 }
 0x156   : > { %v770_v11 = vpop.f32.mrf.mxu2 }
 0x157   : > { %v1129_v38 = vpack.c.bf16 %v770_v11, %v768_v37 }
 0x159   : > { %1161 = vst [vmem:[%s1424_s7 + $0x8] sm:$0xff] %v1129_v38  }
 0x15e   : > { %v773_v39 = vpop.f32.mrf.mxu2 }
 0x163   : > { %v793_v40 = vpop.f32.mrf.mxu3 }
 0x166   : > { %v775_v41 = vpop.f32.mrf.mxu2 }
 0x167   : > { %v1134_v42 = vpack.c.bf16 %v775_v41, %v773_v39 }
 0x169   : > { %1162 = vst [vmem:[%s1424_s7 + $0x10] sm:$0xff] %v1134_v42  }
 0x16b   : > { %v795_v43 = vpop.f32.mrf.mxu3 }
 0x16c   : > { %v1154_v44 = vpack.c.bf16 %v795_v43, %v793_v40 }
 0x16e   : > { %1166 = vst [vmem:[%s1424_s7 + $0x30] sm:$0xff] %v1154_v44   ;;  %v778_v45 = vpop.f32.mrf.mxu2 }
 0x173   : > { %v798_v46 = vpop.f32.mrf.mxu3 }
 0x176   : > { %v780_v47 = vpop.f32.mrf.mxu2 }
 0x177   : > { %v1139_v48 = vpack.c.bf16 %v780_v47, %v778_v45 }
 0x179   : > { %1163 = vst [vmem:[%s1424_s7 + $0x18] sm:$0xff] %v1139_v48  }
 0x17b   : > { %v800_v49 = vpop.f32.mrf.mxu3 }
 0x17c   : > { %v1159_v50 = vpack.c.bf16 %v800_v49, %v798_v46 }
 0x17e   : > { %1167 = vst [vmem:[%s1424_s7 + $0x38] sm:$0xff] %v1159_v50   ;;  %v783_v51 = vpop.f32.mrf.mxu2 }
 0x186   : > { %v785_v52 = vpop.f32.mrf.mxu2 }
 0x187   : > { %v1144_v53 = vpack.c.bf16 %v785_v52, %v783_v51 }
 0x189   : > { %1164 = vst [vmem:[%s1424_s7 + $0x20] sm:$0xff] %v1144_v53  }
 0x18e   : > { %v788_v54 = vpop.f32.mrf.mxu2 }
 0x196   : > { %v790_v55 = vpop.f32.mrf.mxu2 }
 0x197   : > { %v1149_v56 = vpack.c.bf16 %v790_v55, %v788_v54 }
 0x199   : > { %1165 = vst [vmem:[%s1424_s7 + $0x28] sm:$0xff] %v1149_v56  }
 0x19a PF: > { %s14_s17 = sadd.s32 1, %s1239_s17   ;;  %s1448_s15 = smov %s1235_s16 }
 0x19b   : > { %p11_p5 = scmp.ge.s32.totalorder %s14_s17, 4   ;;  %s1449_s16 = smov %s1451_s18 }
 0x19d   :  { %13 = sbr.rel (!%p11_p5) target bundleno = 2 (0x2), region = 75 }

</bundles_post_ra>
